<compile_context>
chip_gen: v7x
topology: tpu7x:2x2x1
jax: 0.10.0
libtpu: 0.0.40
codegen_flags: <defaults>
</compile_context>

<pallas_src>
import functools
import math

import jax
import jax.numpy as jnp
from jax.experimental import pallas as pl
from jax.experimental.pallas import tpu as pltpu


def _vq_kernel(x_ref, g_ref, et_ref, q_ref, oh_ref, kl_ref, *, n):
    """One (batch element, spatial tile) block.

    x_ref : (1, N, T) logits tile            (N on sublanes, T spatial on lanes)
    g_ref : (1, N, T) gumbel-noise tile
    et_ref: (D, N)    transposed embedding table (full, resident)
    q_ref : (1, D, T) quantized output tile
    oh_ref: (1, N, T) hard one-hot output tile
    kl_ref: (1, 1, T) per-spatial-position KL contribution
    """
    x = x_ref[0].astype(jnp.float32)          # (N, T)
    g = g_ref[0].astype(jnp.float32)          # (N, T)

    # ---- hard gumbel argmax over the codebook (sublane) axis ----
    # softmax and the /tau scaling do not change the argmax, so skip them.
    logits = x + g
    l_max = jnp.max(logits, axis=0, keepdims=True)                     # (1, T)
    row = jax.lax.broadcasted_iota(jnp.int32, logits.shape, 0)         # (N, T)
    # first index achieving the max (matches torch.max tie behaviour)
    first_idx = jnp.min(jnp.where(logits == l_max, row, n),
                        axis=0, keepdims=True)                         # (1, T)
    one_hot = (row == first_idx).astype(jnp.float32)                   # (N, T)
    oh_ref[0] = one_hot.astype(oh_ref.dtype)

    # ---- quantize: einsum('b n hw, n d -> b d hw') == (D,N) @ (N,T) ----
    q_ref[0] = jnp.dot(
        et_ref[...].astype(jnp.float32), one_hot,
        preferred_element_type=jnp.float32,
    ).astype(q_ref.dtype)

    # ---- KL(uniform || softmax(x)) per position ----
    # sum_j (1/n) * (log(1/n) - log_softmax(x)_j)
    #   = log(1/n) + logsumexp_j(x_j) - (1/n) * sum_j x_j
    xm = jnp.max(x, axis=0, keepdims=True)                             # (1, T)
    lse = jnp.log(jnp.sum(jnp.exp(x - xm), axis=0, keepdims=True)) + xm
    mean_x = jnp.sum(x, axis=0, keepdims=True) * (1.0 / n)
    kl_ref[0] = (math.log(1.0 / n) + lse - mean_x).astype(kl_ref.dtype)


def vector_quantizer_forward(x_nchw, gumbel_nchw, embedding, *,
                             commitment_cost=0.25, tau=0.9, t_hw=512):
    """Forward pass of VectorQuantizer.

    x_nchw:       [B, N, H, W] float32 logits
    gumbel_nchw:  [B, N, H, W] float32 gumbel noise (sampled outside; the
                  PyTorch module samples it inside F.gumbel_softmax)
    embedding:    [N, D] float32 codebook
    Returns (quantized [B, D, H, W], commitment_cost * kl_div scalar,
             one_hot [B, N, H, W]).
    `tau` is accepted for API parity; the hard forward value is tau-invariant.
    """
    del tau  # argmax is invariant under the temperature for the hard path
    B, N, H, W = x_nchw.shape
    D = embedding.shape[1]
    HW = H * W

    # Spatial tile on the lane axis. Bigger tiles amortize per-step overhead;
    # keep within the scoped VMEM budget (v5e ~16 MiB, v6e/v7x ~32 MiB default,
    # v7x has only 64 MiB physical) — for large N/D cap t_hw or raise
    # vmem_limit_bytes in CompilerParams.
    t_hw = min(t_hw, HW)
    if HW % t_hw != 0 or t_hw % 128 != 0:
        t_hw = HW  # fall back to one spatial tile (block == full dim is legal)

    # Free reshapes (no transpose): channels-first all the way through.
    x3 = x_nchw.reshape(B, N, HW)
    g3 = gumbel_nchw.reshape(B, N, HW)
    emb_t = embedding.T  # (D, N); tiny one-time transpose of the codebook

    grid = (B, HW // t_hw)
    kernel = functools.partial(_vq_kernel, n=N)

    q3, oh3, kl_rows = pl.pallas_call(
        kernel,
        out_shape=(
            jax.ShapeDtypeStruct((B, D, HW), jnp.float32),
            jax.ShapeDtypeStruct((B, N, HW), jnp.float32),
            jax.ShapeDtypeStruct((B, 1, HW), jnp.float32),
        ),
        grid_spec=pltpu.PrefetchScalarGridSpec(
            num_scalar_prefetch=0,
            grid=grid,
            in_specs=[
                pl.BlockSpec((1, N, t_hw), lambda b, t: (b, 0, t)),
                pl.BlockSpec((1, N, t_hw), lambda b, t: (b, 0, t)),
                pl.BlockSpec((D, N), lambda b, t: (0, 0)),
            ],
            out_specs=[
                pl.BlockSpec((1, D, t_hw), lambda b, t: (b, 0, t)),
                pl.BlockSpec((1, N, t_hw), lambda b, t: (b, 0, t)),
                pl.BlockSpec((1, 1, t_hw), lambda b, t: (b, 0, t)),
            ],
        ),
        compiler_params=pltpu.CompilerParams(
            # No cross-tile carry (KL partials are per-tile outputs), so both
            # axes can be sharded across TensorCores on megacore parts.
            dimension_semantics=("parallel", "parallel")),
    )(x3, g3, emb_t)

    quantized = q3.reshape(B, D, H, W)
    one_hot = oh3.reshape(B, N, H, W)
    kl_loss = (commitment_cost / B) * jnp.sum(kl_rows, dtype=jnp.float32)
    return quantized, kl_loss, one_hot


def _reference_forward(x_nchw, gumbel_nchw, embedding, *, commitment_cost=0.25, tau=0.9):
    B, N, H, W = x_nchw.shape
    logits = (x_nchw + gumbel_nchw) / tau
    y_soft = jax.nn.softmax(logits, axis=1)
    idx = jnp.argmax(y_soft, axis=1)
    one_hot = jax.nn.one_hot(idx, N, axis=1, dtype=x_nchw.dtype)
    quantized = jnp.einsum('bnhw,nd->bdhw', one_hot, embedding)
    log_qy = jax.nn.log_softmax(x_nchw, axis=1)
    p = 1.0 / N
    kl = jnp.sum(p * (jnp.log(p) - log_qy)) / B
    return quantized, commitment_cost * kl, one_hot


if __name__ == "__main__":
    B, N, H, W = 2, 8, 16, 16          # N = num_embeddings (channel dim of x)
    D = 32                              # embedding_dim
    commitment_cost, tau = 0.25, 0.9

    key = jax.random.PRNGKey(0)
    kx, kg, ke = jax.random.split(key, 3)

    x = jax.random.normal(kx, (B, N, H, W), dtype=jnp.float32)
    # TODO(synk): PyTorch samples the gumbel noise inside F.gumbel_softmax;
    # here it is a deterministic explicit input so results are reproducible.
    gumbel = jax.random.gumbel(kg, (B, N, H, W), dtype=jnp.float32)
    # nn.Embedding(num_embeddings, embedding_dim).weight.uniform_(-0.5, 0.5)
    embedding = jax.random.uniform(ke, (N, D), dtype=jnp.float32,
                                   minval=-0.5, maxval=0.5)

    quantized, kl_loss, one_hot = vector_quantizer_forward(
        x, gumbel, embedding, commitment_cost=commitment_cost, tau=tau)
    jax.block_until_ready((quantized, kl_loss, one_hot))

    q_ref, kl_ref, oh_ref = _reference_forward(
        x, gumbel, embedding, commitment_cost=commitment_cost, tau=tau)

    assert quantized.shape == (B, D, H, W)
    assert one_hot.shape == (B, N, H, W)
    assert jnp.allclose(quantized, q_ref, atol=1e-5, rtol=1e-5)
    assert jnp.allclose(one_hot, oh_ref)
    # KL uses an algebraically simplified form and a different summation order.
    assert jnp.allclose(kl_loss, kl_ref, atol=1e-4, rtol=1e-4)

    print("KERNEL_OK")
</pallas_src>

<mosaic_0001>
module attributes {stable_mosaic.version = 11 : i64} {
  func.func @_vq_kernel(%arg0: i32, %arg1: i32, %arg2: memref<1x8x256xf32, #tpu.memory_space<vmem>>, %arg3: memref<1x8x256xf32, #tpu.memory_space<vmem>>, %arg4: memref<32x8xf32, #tpu.memory_space<vmem>>, %arg5: memref<1x32x256xf32, #tpu.memory_space<vmem>>, %arg6: memref<1x8x256xf32, #tpu.memory_space<vmem>>, %arg7: memref<1x1x256xf32, #tpu.memory_space<vmem>>) attributes {dimension_semantics = [#tpu.dimension_semantics<parallel>, #tpu.dimension_semantics<parallel>], iteration_bounds = array<i64: 2, 1>, scalar_prefetch = 0 : i64, scratch_operands = 0 : i64, tpu.core_type = #tpu.core_type<tc>, window_params = [{transform_indices = @transform_0, window_bounds = array<i64: 1, 8, 256>}, {transform_indices = @transform_1, window_bounds = array<i64: 1, 8, 256>}, {pipeline_mode = #tpu.pipeline_mode<synchronous>, transform_indices = @transform_2, window_bounds = array<i64: 32, 8>}, {transform_indices = @transform_3, window_bounds = array<i64: 1, 32, 256>}, {transform_indices = @transform_4, window_bounds = array<i64: 1, 8, 256>}, {transform_indices = @transform_5, window_bounds = array<i64: 1, 1, 256>}]} {
    %c0 = arith.constant 0 : index
    %c0_0 = arith.constant 0 : index
    %c0_1 = arith.constant 0 : index
    %0 = vector.load %arg2[%c0, %c0_0, %c0_1] : memref<1x8x256xf32, #tpu.memory_space<vmem>>, vector<1x8x256xf32>
    %1 = vector.shape_cast %0 : vector<1x8x256xf32> to vector<8x256xf32>
    %c0_2 = arith.constant 0 : index
    %c0_3 = arith.constant 0 : index
    %c0_4 = arith.constant 0 : index
    %2 = vector.load %arg3[%c0_2, %c0_3, %c0_4] : memref<1x8x256xf32, #tpu.memory_space<vmem>>, vector<1x8x256xf32>
    %3 = vector.shape_cast %2 : vector<1x8x256xf32> to vector<8x256xf32>
    %4 = arith.addf %1, %3 : vector<8x256xf32>
    %cst = arith.constant dense<0xFF800000> : vector<256xf32>
    %5 = vector.multi_reduction <maximumf>, %4, %cst [0] : vector<8x256xf32> to vector<256xf32>
    %6 = vector.shape_cast %5 : vector<256xf32> to vector<1x256xf32>
    %7 = tpu.iota {dimensions = array<i32: 0>} : vector<8x256xi32>
    %8 = vector.broadcast %6 : vector<1x256xf32> to vector<8x256xf32>
    %9 = arith.cmpf oeq, %4, %8 : vector<8x256xf32>
    %c8_i32 = arith.constant 8 : i32
    %10 = vector.broadcast %c8_i32 : i32 to vector<8x256xi32>
    %11 = arith.select %9, %7, %10 : vector<8x256xi1>, vector<8x256xi32>
    %cst_5 = arith.constant dense<2147483647> : vector<256xi32>
    %12 = vector.multi_reduction <minsi>, %11, %cst_5 [0] : vector<8x256xi32> to vector<256xi32>
    %13 = vector.shape_cast %12 : vector<256xi32> to vector<1x256xi32>
    %14 = vector.broadcast %13 : vector<1x256xi32> to vector<8x256xi32>
    %15 = arith.cmpi eq, %7, %14 : vector<8x256xi32>
    %16 = arith.extui %15 : vector<8x256xi1> to vector<8x256xi32>
    %17 = arith.sitofp %16 : vector<8x256xi32> to vector<8x256xf32>
    %c0_6 = arith.constant 0 : index
    %c0_7 = arith.constant 0 : index
    %c0_8 = arith.constant 0 : index
    %18 = vector.load %arg6[%c0_6, %c0_7, %c0_8] : memref<1x8x256xf32, #tpu.memory_space<vmem>>, vector<1x8x256xf32>
    %19 = vector.shape_cast %18 : vector<1x8x256xf32> to vector<8x256xf32>
    %20 = vector.shape_cast %17 : vector<8x256xf32> to vector<1x8x256xf32>
    tpu.vector_store %arg6[%c0_6, %c0_7, %c0_8], %20 {strides = array<i32>} : memref<1x8x256xf32, #tpu.memory_space<vmem>>, vector<1x8x256xf32>,
    %c0_9 = arith.constant 0 : index
    %c0_10 = arith.constant 0 : index
    %21 = vector.load %arg4[%c0_9, %c0_10] : memref<32x8xf32, #tpu.memory_space<vmem>>, vector<32x8xf32>
    %cst_11 = arith.constant dense<0.000000e+00> : vector<32x256xf32>
    %22 = tpu.matmul %21, %17, %cst_11 {dimension_numbers = #tpu.dot_dimension_numbers<[1], [0], [0], [1], [0, 0, 1, 1], [], []>} : vector<32x8xf32>, vector<8x256xf32>, vector<32x256xf32> -> vector<32x256xf32>
    %c0_12 = arith.constant 0 : index
    %c0_13 = arith.constant 0 : index
    %c0_14 = arith.constant 0 : index
    %23 = vector.load %arg5[%c0_12, %c0_13, %c0_14] : memref<1x32x256xf32, #tpu.memory_space<vmem>>, vector<1x32x256xf32>
    %24 = vector.shape_cast %23 : vector<1x32x256xf32> to vector<32x256xf32>
    %25 = vector.shape_cast %22 : vector<32x256xf32> to vector<1x32x256xf32>
    tpu.vector_store %arg5[%c0_12, %c0_13, %c0_14], %25 {strides = array<i32>} : memref<1x32x256xf32, #tpu.memory_space<vmem>>, vector<1x32x256xf32>,
    %cst_15 = arith.constant dense<0xFF800000> : vector<256xf32>
    %26 = vector.multi_reduction <maximumf>, %1, %cst_15 [0] : vector<8x256xf32> to vector<256xf32>
    %27 = vector.shape_cast %26 : vector<256xf32> to vector<1x256xf32>
    %28 = vector.broadcast %27 : vector<1x256xf32> to vector<8x256xf32>
    %29 = arith.subf %1, %28 : vector<8x256xf32>
    %30 = math.exp %29 : vector<8x256xf32>
    %cst_16 = arith.constant dense<0.000000e+00> : vector<256xf32>
    %31 = vector.multi_reduction <add>, %30, %cst_16 [0] : vector<8x256xf32> to vector<256xf32>
    %32 = vector.shape_cast %31 : vector<256xf32> to vector<1x256xf32>
    %33 = math.log %32 : vector<1x256xf32>
    %34 = arith.addf %33, %27 : vector<1x256xf32>
    %cst_17 = arith.constant dense<0.000000e+00> : vector<256xf32>
    %35 = vector.multi_reduction <add>, %1, %cst_17 [0] : vector<8x256xf32> to vector<256xf32>
    %36 = vector.shape_cast %35 : vector<256xf32> to vector<1x256xf32>
    %cst_18 = arith.constant 1.250000e-01 : f32
    %37 = vector.broadcast %cst_18 : f32 to vector<1x256xf32>
    %38 = arith.mulf %36, %37 : vector<1x256xf32>
    %cst_19 = arith.constant -2.07944155 : f32
    %39 = vector.broadcast %cst_19 : f32 to vector<1x256xf32>
    %40 = arith.addf %39, %34 : vector<1x256xf32>
    %41 = arith.subf %40, %38 : vector<1x256xf32>
    %c0_20 = arith.constant 0 : index
    %c0_21 = arith.constant 0 : index
    %c0_22 = arith.constant 0 : index
    %42 = vector.load %arg7[%c0_20, %c0_21, %c0_22] : memref<1x1x256xf32, #tpu.memory_space<vmem>>, vector<1x1x256xf32>
    %43 = vector.shape_cast %42 : vector<1x1x256xf32> to vector<1x256xf32>
    %44 = vector.shape_cast %41 : vector<1x256xf32> to vector<1x1x256xf32>
    tpu.vector_store %arg7[%c0_20, %c0_21, %c0_22], %44 {strides = array<i32>} : memref<1x1x256xf32, #tpu.memory_space<vmem>>, vector<1x1x256xf32>,
    return
  }
  func.func @transform_0(%arg0: i32, %arg1: i32) -> (i32, i32, i32) {
    %c0_i32 = arith.constant 0 : i32
    %c0_i32_0 = arith.constant 0 : i32
    return %arg0, %c0_i32, %arg1 : i32, i32, i32
  }
  func.func @transform_1(%arg0: i32, %arg1: i32) -> (i32, i32, i32) {
    %c0_i32 = arith.constant 0 : i32
    %c0_i32_0 = arith.constant 0 : i32
    return %arg0, %c0_i32, %arg1 : i32, i32, i32
  }
  func.func @transform_2(%arg0: i32, %arg1: i32) -> (i32, i32) {
    %c0_i32 = arith.constant 0 : i32
    %c0_i32_0 = arith.constant 0 : i32
    %c0_i32_1 = arith.constant 0 : i32
    return %c0_i32, %c0_i32_0 : i32, i32
  }
  func.func @transform_3(%arg0: i32, %arg1: i32) -> (i32, i32, i32) {
    %c0_i32 = arith.constant 0 : i32
    %c0_i32_0 = arith.constant 0 : i32
    return %arg0, %c0_i32, %arg1 : i32, i32, i32
  }
  func.func @transform_4(%arg0: i32, %arg1: i32) -> (i32, i32, i32) {
    %c0_i32 = arith.constant 0 : i32
    %c0_i32_0 = arith.constant 0 : i32
    return %arg0, %c0_i32, %arg1 : i32, i32, i32
  }
  func.func @transform_5(%arg0: i32, %arg1: i32) -> (i32, i32, i32) {
    %c0_i32 = arith.constant 0 : i32
    %c0_i32_0 = arith.constant 0 : i32
    return %arg0, %c0_i32, %arg1 : i32, i32, i32
  }
}

</mosaic_0001>

<bundles_post_ra>
// kernel: tpu_custom_call.1
= control target key start
LH: loop header
LB: loop body
LE: loop exit
PB: predicated region body
PF: predicated region fallthrough
CT: control target
= control target key end

     0   :  { %11 = vsyncpa [#allocation3], 0  ;;  %s1425_s0 = inlined_call_operand.vmem [shape: f32[2,8,256], index: 0, kind: input, shape index: {}]   ;;  %s1426_s1 = inlined_call_operand.hbm [shape: f32[2,8,256], index: 1, kind: input, shape index: {}]   ;;  %s1427_s2 = inlined_call_operand.vmem [shape: f32[32,8], index: 2, kind: input, shape index: {}]   ;;  %s1428_s3 = inlined_call_operand.hbm [shape: f32[2,32,256], index: 3, kind: output, shape index: {0}]   ;;  %s1429_s4 = inlined_call_operand.hbm [shape: f32[2,8,256], index: 4, kind: output, shape index: {1}]   ;;  %s1430_s5 = inlined_call_operand.hbm [shape: f32[2,1,256], index: 5, kind: output, shape index: {2}]  }
   0x1   :  { %13 = vsyncpa [#allocation3 + $0x1], 0 }
   0x2   :  { %14 = vsyncpa [#allocation4], 0 }
   0x3   :  { %16 = vsyncpa [#allocation4 + $0x1], 0 }
   0x4   :  { %17 = vsyncpa [#allocation7], 0 }
   0x5   :  { %19 = vsyncpa [#allocation7 + $0x1], 0  ;;  %s1130_s18 = smov 0   ;;  %s1132_s19 = smov 0  }
   0x6   :  { %s1134_s20 = smov 0   ;;  %s1136_s21 = smov 0  }
   0x7   :  { %s1138_s22 = smov 0   ;;  %s1140_s23 = smov 0  }
   0x8 LB: > { %s1161_s24 = sadd.s32 4294967295, %s1089_s23   ;;  %s793_s25 = sadd.s32 4294967294, %s1089_s23   ;;  %s1089_s23 = sphi %s1140_s23, %s25_s23   ;;  %s1085_s22 = sphi %s1138_s22, %s1446_s22   ;;  %s1081_s21 = sphi %s1136_s21, %s1445_s21   ;;  %s1077_s20 = sphi %s1134_s20, %s1444_s20   ;;  %s1073_s19 = sphi %s1132_s19, %s1443_s19   ;;  %s1069_s18 = sphi %s1130_s18, %s1442_s18  }
   0x9   : > { %s37_s26 = sadd.s32 1, %s1085_s22  ;;  %s74_s27 = sadd.s32 1, %s1077_s20 }
   0xa   : > { %p39_p0 = scmp.ge.s32.totalorder %s37_s26, 2  ;;  %p81_p1 = scmp.ne.s32.totalorder %s1077_s20, %s1073_s19 }
   0xb   : > { %p82_p2 = scmp.eq.s32.totalorder %s1089_s23, 0  ;;  %p87_p3 = scmp.ne.s32.totalorder %s1073_s19, %s1069_s18 }
   0xc   : > { %s1448_s26 = smov (%p39_p0, %s37_s26), 0  ;;  %p88_p5 = scmp.eq.s32.totalorder %s1161_s24, 0 }
   0xd   : > { %p1173_p4 = por %p82_p2, %p81_p1  ;;  %s69_s29 = ssub.s32 %s1085_s22, %s1448_s26 }
   0xe   : > { %p134_p6 = scmp.eq.s32.totalorder %s1161_s24, 1  ;;  %p72_p7 = scmp.eq.s32.totalorder %s69_s29, 0 }
   0xf   : > { %p1181_p8 = por %p88_p5, %p87_p3  ;;  %p140_p10 = scmp.eq.s32.totalorder %s793_s25, 1 }
  0x10   : > { %p1185_p9 = por %p134_p6, %p81_p1  ;;  %p854_p13 = scmp.lt.s32.totalorder %s1089_s23, 2 }
  0x11   : > { %s1192_s7 = scalar_select %p72_p7, %s1077_s20, %s74_s27  }
  0x12   : > { %s1434_s6 = scalar_select %p1185_p9, 1, 0 }
  0x13   : > { %p1194_p11 = por %p140_p10, %p87_p3  ;;  %s232_s9 = sand.u32 1, %s1077_s20  }
  0x14   : > { %s796_s10 = sshll.u32 %s232_s9, 4  ;;  %s825_s11 = sshll.u32 %s1085_s22, 8 }
  0x15   : > { %s1435_s8 = scalar_select %p1194_p11, 1, 0 }
  0x16   : > { %s1205_s14 = scalar_lea.hbm %s1426_s1, %s825_s11  ;;  %s236_s15 = scalar_lea.vmem [#allocation2], %s796_s10 }
  0x17   : > { %s246_s16 = sshll.u32 %s236_s15, 4  ;;  %p1211_p0 = pnand %p854_p13, %p1173_p4  ;;  %s1207_s16 = int_to_ptr.vmem [resolvable:$true] %s246_s16 }
  0x18   : > { %s233_s27 = scalar_lea.sflag [#allocation3], %s232_s9  ;;  %s917_s29 = scalar_lea.hbm %s1205_s14, 256 }
  0x19   : > { %p918_p3 = scmp.ne.s32.totalorder %s1205_s14, %s917_s29  ;;  %p919_p5 = pneg %p1211_p0 }
  0x1a   : > { %s922_s28 = scalar_lea.hbm %s1426_s1, 512  ;;  %p923_p4 = scmp.lt.u32.totalorder %s1205_s14, %s1426_s1 }
  0x1b   : > { %p920_p6 = pnand %p919_p5, %p918_p3  ;;  %p924_p10 = scmp.lt.u32.totalorder %s922_s28, %s917_s29 }
  0x1c   : > { %p926_p12 = scmp.lt.u32.totalorder %s917_s29, %s1205_s14 }
  0x1d   : > { %p921_p7 = pneg %p920_p6  ;;  %p925_p13 = por %p924_p10, %p923_p4 }
  0x1f   : > { %p927_p1 = por %p926_p12, %p925_p13 }
  0x21   : > { %p928_p2 = pnand %p927_p1, %p921_p7 }
  0x23   : > { %931 = shalt.err (!%p928_p2)
}
  0x24   : > { %s932_s9 = scalar_lea.vmem %s1207_s16, 256  ;;  %s1091_s15 = smov [#allocation2]  }
  0x25   : > { %p933_p3 = scmp.ne.s32.totalorder %s1207_s16, %s932_s9  ;;  %s937_s10 = sshll.u32 %s1091_s15, 4  ;;  %s938_s10 = int_to_ptr.vmem [resolvable:$false] %s937_s10 }
  0x26   : > { %s939_s11 = scalar_lea.vmem %s938_s10, 512  ;;  %p940_p9 = scmp.lt.s32.totalorder %s1207_s16, %s938_s10 }
  0x27   : > { %p935_p6 = pnand %p933_p3, %p919_p5  ;;  %p941_p4 = scmp.lt.s32.totalorder %s939_s11, %s932_s9 }
  0x29   : > { %p936_p11 = pneg %p935_p6  ;;  %p942_p10 = por %p941_p4, %p940_p9 }
  0x2b   : > { %p943_p12 = pnand %p942_p10, %p936_p11 }
  0x2d   : > { %946 = shalt.err (!%p943_p12)
}
  0x2e   : > { %843 = dma.hbm_to_vmem [thread:$0]  (!%p1211_p0), %s1205_s14, 256, %s1207_s16, %s233_s27  }
  0x2f   : > { %p1437_p1 = scmp.lt.s32.totalorder %s1089_s23, 3  ;;  %p1438_p2 = scmp.ge.s32.totalorder %s1089_s23, 1 }
  0x31   : > { %p252_p5 = pnand %p1438_p2, %p1437_p1 }
  0x32   : > { %s1247_s29 = sand.u32 (!%p252_p5), 1, %s1073_s19  }
  0x33   : > { %255 = sbr.rel (%p252_p5) target bundleno = 329 (0x149), region = 32  ;;  %s800_s28 = sshll.u32 (!%p252_p5), %s1247_s29, 4 }
  0x34   : > { %s258_s12 = scalar_lea.sflag (!%p252_p5), [#allocation3], %s1247_s29  ;;  %s261_s17 = scalar_lea.vmem (!%p252_p5), [#allocation2], %s800_s28 }
  0x3a   : > { %1056 = dma.done.wait (%p1181_p8), %s258_s12, 256  }
  0x3b   : > { %1058 = vsyncadd (%p1181_p8), %s258_s12, 4294967040  ;;  %p308_p9 = scmp.lt.s32.totalorder %s1081_s21, 1  ;;  %v1092_v0 = vmov 0.0   ;;  %v324_v2 = vld [vmem:[%s261_s17 + $0x8] sm:$0xff]  ;;  %v323_v5 = vld [vmem:[%s261_s17] sm:$0xff]  ;;  %v339_v12 = vlaneseq  ;;  %vm375_vm9 = vcmask 64512  }
  0x3c   : > { %452 = vmatprep.mubr.f32.mxu0 %v1092_v0  ;;  %464 = vmatprep.mubr.f32.mxu1 %v1092_v0  ;;  %v371_v35 = vld [vmem:[%s1427_s2] sm:$0xff]  ;;  %v373_v36 = vld [vmem:[%s1427_s2 + $0x10] sm:$0xff]  ;;  %v1093_v38 = vmov 1.0   ;;  %s1286_s12 = scalar_lea.vmem [#allocation6], %s800_s28  ;;  %v372_v40 = vld [vmem:[%s1427_s2 + $0x8] sm:$0xff]  ;;  %s567_s27 = sand.u32 1, %s1161_s24  }
  0x3d   : > { %s309_s14 = scalar_select %p308_p9, %s1081_s21, 1  ;;  %v1271_v17 = vshrl.u32 %v339_v12, 7  ;;  %v374_v41 = vld [vmem:[%s1427_s2 + $0x18] sm:$0xff] }
  0x3e   : > { %s828_s13 = sshll.u32 %s1081_s21, 8  ;;  %s607_s10 = sshll.u32 %s1286_s12, 4  ;;  %s1320_s10 = int_to_ptr.vmem [resolvable:$true] %s607_s10 }
  0x3f   : > { %s826_s16 = sshll.u32 %s309_s14, 4  ;;  %s1317_s15 = scalar_lea.hbm %s1429_s4, %s828_s13 }
  0x40   : > { %s315_s9 = scalar_lea.vmem %s1425_s0, %s826_s16  ;;  %s803_s11 = sshll.u32 %s1247_s29, 1 }
  0x41   : > { %v1264_v1 = vld [vmem:[%s315_s9 + $0x8] sm:$0xff]  ;;  %v1266_v3 = vld [vmem:[%s315_s9] sm:$0xff]  ;;  %s1323_s17 = scalar_lea.sflag [#allocation7], %s567_s27  ;;  %s947_s14 = scalar_lea.vmem %s1320_s10, 256 }
  0x42   : > { %v326_v4 = vadd.f32 %v324_v2, %v1264_v1  ;;  %v325_v6 = vadd.f32 %v323_v5, %v1266_v3  ;;  %v491_v42 = vrot.slane %v1264_v1, 4  ;;  %v485_v43 = vrot.slane %v1266_v3, 4  ;;  %p948_p8 = scmp.ne.s32.totalorder %s1320_s10, %s947_s14  ;;  %p1439_p11 = scmp.ne.s32.totalorder %s1434_s6, 0 }
  0x43   : > { %s1095_s24 = smov [#allocation6]  }
  0x44   : > { %v333_v7 = vrot.slane %v326_v4, 4  ;;  %v327_v8 = vrot.slane %v325_v6, 4  ;;  %v492_v44 = vmax.f32 %v1264_v1, %v491_v42  ;;  %v486_v45 = vmax.f32 %v1266_v3, %v485_v43  ;;  %p949_p0 = pnand %p948_p8, %p1439_p11  ;;  %s951_s28 = sshll.u32 %s1095_s24, 4  ;;  %s952_s28 = int_to_ptr.vmem [resolvable:$false] %s951_s28 }
  0x45   : > { %s953_s16 = scalar_lea.vmem %s952_s28, 512  ;;  %p954_p13 = scmp.lt.s32.totalorder %s1320_s10, %s952_s28 }
  0x46   : > { %v334_v9 = vmax.f32 %v326_v4, %v333_v7  ;;  %v328_v10 = vmax.f32 %v325_v6, %v327_v8  ;;  %v493_v46 = vrot.slane %v492_v44, 2  ;;  %v487_v47 = vrot.slane %v486_v45, 2  ;;  %p950_p7 = pneg %p949_p0  ;;  %p955_p3 = scmp.lt.s32.totalorder %s953_s16, %s947_s14 }
  0x48   : > { %v335_v11 = vrot.slane %v334_v9, 2  ;;  %v329_v13 = vrot.slane %v328_v10, 2  ;;  %v488_v48 = vmax.f32 %v486_v45, %v487_v47  ;;  %v494_v49 = vmax.f32 %v492_v44, %v493_v46  ;;  %p956_p6 = por %p955_p3, %p954_p13 }
  0x4a   : > { %v336_v14 = vmax.f32 %v334_v9, %v335_v11  ;;  %v330_v15 = vmax.f32 %v328_v10, %v329_v13  ;;  %v489_v50 = vrot.slane %v488_v48, 1  ;;  %v495_v51 = vrot.slane %v494_v49, 1  ;;  %p957_p4 = pnand %p956_p6, %p950_p7 }
  0x4b   : > { %v528_v10 = vadd.f32 %v491_v42, %v1264_v1  ;;  %v522_v11 = vadd.f32 %v485_v43, %v1266_v3 }
  0x4c   : > { %v337_v16 = vrot.slane %v336_v14, 1  ;;  %v331_v18 = vrot.slane %v330_v15, 1  ;;  %v490_v52 = vmax.f32 %v488_v48, %v489_v50  ;;  %v496_v53 = vmax.f32 %v494_v49, %v495_v51 }
  0x4d   : > { %v523_v13 = vrot.slane %v522_v11, 2 }
  0x4e   : > { %v338_v19 = vmax.f32 %v336_v14, %v337_v16  ;;  %v332_v20 = vmax.f32 %v330_v15, %v331_v18  ;;  %v497_v54 = vsub.f32 %v1266_v3, %v490_v52  ;;  %v498_v55 = vsub.f32 %v1264_v1, %v496_v53 }
  0x4f   : > { %v529_v14 = vrot.slane %v528_v10, 2  ;;  %v524_v15 = vadd.f32 %v523_v13, %v522_v11 }
  0x50   : > { %vm342_vm0 = vcmp.eq.f32.partialorder %v326_v4, %v338_v19  ;;  %vm341_vm1 = vcmp.eq.f32.partialorder %v325_v6, %v332_v20  ;;  %v499_v56 = vmul.f32 1.442695, %v497_v54  ;;  %v501_v57 = vmul.f32 1.442695, %v498_v55 }
  0x51   : > { %v344_v21 = vsel %vm342_vm0, %v1271_v17, 8  ;;  %v343_v23 = vsel %vm341_vm1, %v1271_v17, 8  ;;  %v530_v16 = vadd.f32 %v529_v14, %v528_v10 }
  0x52   : > { %v354_v22 = vrot.slane %v344_v21, 4  ;;  %v345_v24 = vrot.slane %v343_v23, 4  ;;  %909 = vpow2.f32 %v499_v56 }
  0x53   : > { %911 = vpow2.f32 %v501_v57 }
  0x54   : > { %vm355_vm2 = vcmp.lt.s32.totalorder %v344_v21, %v354_v22  ;;  %vm346_vm3 = vcmp.lt.s32.totalorder %v343_v23, %v345_v24 }
  0x55   : > { %v356_v25 = vsel %vm355_vm2, %v344_v21, %v354_v22  ;;  %v347_v27 = vsel %vm346_vm3, %v343_v23, %v345_v24  ;;  %v525_v21 = vrot.slane %v524_v15, 1  ;;  %v531_v22 = vrot.slane %v530_v16, 1 }
  0x56   : > { %v357_v26 = vrot.slane %v356_v25, 2  ;;  %v348_v28 = vrot.slane %v347_v27, 2 }
  0x58   : > { %vm358_vm4 = vcmp.lt.s32.totalorder %v356_v25, %v357_v26  ;;  %vm349_vm5 = vcmp.lt.s32.totalorder %v347_v27, %v348_v28 }
  0x59   : > { %v359_v29 = vsel %vm358_vm4, %v356_v25, %v357_v26  ;;  %v350_v31 = vsel %vm349_vm5, %v347_v27, %v348_v28  ;;  %v526_v25 = vadd.f32 %v525_v21, %v524_v15  ;;  %v532_v26 = vadd.f32 %v531_v22, %v530_v16 }
  0x5a   : > { %v360_v30 = vrot.slane %v359_v29, 1  ;;  %v351_v32 = vrot.slane %v350_v31, 1 }
  0x5b   : > { %v533_v1 = vmul.f32 0.125, %v526_v25  ;;  %v534_v28 = vmul.f32 0.125, %v532_v26 }
  0x5c   : > { %vm361_vm6 = vcmp.lt.s32.totalorder %v359_v29, %v360_v30  ;;  %vm352_vm7 = vcmp.lt.s32.totalorder %v350_v31, %v351_v32  ;;  %v910_v58 = vpop.eup %909 }
  0x5d   : > { %v362_v33 = vsel %vm361_vm6, %v359_v29, %v360_v30  ;;  %v353_v34 = vsel %vm352_vm7, %v350_v31, %v351_v32  ;;  %v912_v59 = vpop.eup %911  ;;  %v503_v60 = vrot.slane %v910_v58, 4  ;;  %v1094_v29 = vmov 1966171168  }
  0x5e   : > { %vm364_vm8 = vcmp.eq.s32.totalorder %v1271_v17, %v362_v33  ;;  %vm363_vm10 = vcmp.eq.s32.totalorder %v1271_v17, %v353_v34  ;;  %v509_v61 = vrot.slane %v912_v59, 4  ;;  %v543_v30 = vunpack.c.l.s4 %v1094_v29 }
  0x5f   : > { %v807_v37 = vsel %vm364_vm8, 1.0, %v1092_v0  ;;  %808 = vmatprep.subr.msk.mxu0 %vm364_vm8, %v1093_v38  ;;  %830 = vmatprep.subr.msk.mxu1 %vm364_vm8, %v1093_v38  ;;  %v806_v39 = vsel %vm363_vm10, 1.0, %v1092_v0  ;;  %v504_v62 = vadd.f32 %v910_v58, %v503_v60 }
  0x60   : > { %370 = vst [vmem:[%s1286_s12 + $0x8] sm:$0xff] %v807_v37  ;;  %809 = vmatpush1.msk.msra.mxu0 %vm363_vm10, %v1093_v38  ;;  %831 = vmatpush1.msk.msra.mxu1 %vm363_vm10, %v1093_v38  ;;  %369 = vst [vmem:[%s1286_s12] sm:$0xff] %v806_v39  ;;  %v510_v63 = vadd.f32 %v912_v59, %v509_v61  ;;  %v544_v33 = vunpack.c.0.s8 %v543_v30 }
  0x61   : > { %810 = vmatmul.mubr.msk.f32.vlgmr.msra.gmra.mrb[0].mxu0 %vm375_vm9, %v371_v35  ;;  %812 = vmatmul.mubr.msk.f32.vlgmr.msra.gmra.mrb[0].mxu1 %vm375_vm9, %v373_v36 }
  0x62   : > { %458 = vmatprep.mubr.f32.mxu0 %v1092_v0  ;;  %470 = vmatprep.mubr.f32.mxu1 %v1092_v0  ;;  %v505_v0 = vrot.slane %v504_v62, 2  ;;  %v511_v2 = vrot.slane %v510_v63, 2  ;;  %v547_v35 = vsub.s32 %v544_v33, %v1271_v17 }
  0x64   : > { %v506_v4 = vadd.f32 %v505_v0, %v504_v62  ;;  %v512_v5 = vadd.f32 %v511_v2, %v510_v63 }
  0x65   : > { %811 = vmatmul.mubr.msk.f32.gmra.mrb[2].mxu0 %vm375_vm9, %v372_v40  ;;  %813 = vmatmul.mubr.msk.f32.gmra.mrb[2].mxu1 %vm375_vm9, %v374_v41 }
  0x66   : > { %v507_v6 = vrot.slane %v506_v4, 1  ;;  %v513_v7 = vrot.slane %v512_v5, 1 }
  0x68   : > { %v508_v8 = vadd.f32 %v507_v6, %v506_v4  ;;  %v514_v9 = vadd.f32 %v513_v7, %v512_v5 }
  0x6a   : > { %913 = vlog2.f32 %v508_v8 }
  0x6b   : > { %915 = vlog2.f32 %v514_v9 }
  0x74   : > { %v914_v18 = vpop.eup %913 }
  0x75   : > { %v916_v19 = vpop.eup %915  ;;  %v516_v20 = vmul.f32 0.6931472, %v914_v18 }
  0x76   : > { %v518_v23 = vmul.f32 0.6931472, %v916_v19 }
  0x77   : > { %v519_v24 = vadd.f32 %v516_v20, %v490_v52 }
  0x78   : > { %v520_v27 = vadd.f32 %v518_v23, %v496_v53 }
  0x79   : > { %v535_v3 = vadd.f32 -2.0794415, %v519_v24 }
  0x7a   : > { %v536_v31 = vadd.f32 -2.0794415, %v520_v27 }
  0x7b   : > { %v537_v32 = vsub.f32 %v535_v3, %v533_v1 }
  0x7c   : > { %v538_v34 = vsub.f32 %v536_v31, %v534_v28 }
  0x7e   : > { %v541_v36 = vcombine.low %v537_v32, %v538_v34 }
  0x80   : > { %v548_v37 = vrot.slane %v541_v36, %v547_v35 }
  0x82   : > { %v555_v38 = vrot.slane %v548_v37, %v547_v35 }
  0x83   : > { %960 = shalt.err (!%p957_p4)
}
  0x84   : > { %s961_s12 = scalar_lea.hbm %s1317_s15, 256  ;;  %s965_s9 = scalar_lea.hbm %s1429_s4, 512 }
  0x85   : > { %p962_p10 = scmp.ne.s32.totalorder %s1317_s15, %s961_s12  ;;  %p966_p2 = scmp.lt.u32.totalorder %s1317_s15, %s1429_s4 }
  0x86   : > { %p967_p5 = scmp.lt.u32.totalorder %s965_s9, %s961_s12  ;;  %p969_p8 = scmp.lt.u32.totalorder %s961_s12, %s1317_s15 }
  0x87   : > { %p963_p12 = pnand %p962_p10, %p1439_p11 }
  0x88   : > { %p968_p9 = por %p967_p5, %p966_p2 }
  0x89   : > { %p964_p1 = pneg %p963_p12 }
  0x8a   : > { %p970_p0 = por %p969_p8, %p968_p9 }
  0x8c   : > { %p971_p7 = pnand %p970_p0, %p964_p1 }
  0x8e   : > { %974 = shalt.err (!%p971_p7)
}
  0x8f   : > { %835 = dma.vmem_to_hbm [thread:$0]  (%p1439_p11), %s1320_s10, 256, %s1317_s15, %s1323_s17   ;;  %vm559_vm11 = vcmp.lt.s32.totalorder %v339_v12, 256 }
  0x90   : > { %s306_s14 = scalar_lea.vmem [#allocation8], %s803_s11  ;;  %s829_s28 = sshll.u32 %s1081_s21, 5 }
  0x91   : > { %561 = vst.msk [vmem:[%s306_s14] sm:$0x3] %vm559_vm11, %v555_v38  ;;  %s623_s16 = sshll.u32 %s306_s14, 4  ;;  %s621_s13 = scalar_lea.hbm %s1430_s5, %s829_s28  ;;  %s624_s16 = int_to_ptr.vmem [resolvable:$true] %s623_s16 }
  0x92   : > { %s975_s9 = scalar_lea.vmem %s624_s16, 32  ;;  %s1096_s30 = smov [#allocation8]  }
  0x93   : > { %p976_p13 = scmp.ne.s32.totalorder %s624_s16, %s975_s9  ;;  %s979_s24 = sshll.u32 %s1096_s30, 4  ;;  %s980_s24 = int_to_ptr.vmem [resolvable:$false] %s979_s24 }
  0x94   : > { %s981_s15 = scalar_lea.vmem %s980_s24, 64  ;;  %p982_p4 = scmp.lt.s32.totalorder %s624_s16, %s980_s24 }
  0x95   : > { %p977_p3 = pnand %p976_p13, %p1439_p11  ;;  %p983_p10 = scmp.lt.s32.totalorder %s981_s15, %s975_s9 }
  0x97   : > { %p978_p6 = pneg %p977_p3  ;;  %p984_p12 = por %p983_p10, %p982_p4 }
  0x99   : > { %p985_p1 = pnand %p984_p12, %p978_p6 }
  0x9b   : > { %988 = shalt.err (!%p985_p1)
}
  0x9c   : > { %s989_s10 = scalar_lea.hbm %s621_s13, 32  ;;  %s993_s28 = scalar_lea.hbm %s1430_s5, 64 }
  0x9d   : > { %p990_p2 = scmp.ne.s32.totalorder %s621_s13, %s989_s10  ;;  %p994_p8 = scmp.lt.u32.totalorder %s621_s13, %s1430_s5 }
  0x9e   : > { %p995_p0 = scmp.lt.u32.totalorder %s993_s28, %s989_s10  ;;  %p997_p13 = scmp.lt.u32.totalorder %s989_s10, %s621_s13 }
  0x9f   : > { %p991_p5 = pnand %p990_p2, %p1439_p11 }
  0xa0   : > { %p996_p7 = por %p995_p0, %p994_p8 }
  0xa1   : > { %p992_p9 = pneg %p991_p5 }
  0xa2   : > { %p998_p3 = por %p997_p13, %p996_p7 }
  0xa4   : > { %p999_p6 = pnand %p998_p3, %p992_p9 }
  0xa6   : > { %1002 = shalt.err (!%p999_p6)
}
  0xa7   : > { %836 = dma.vmem_to_hbm [thread:$0]  (%p1439_p11), %s624_s16, 32, %s621_s13, %s1323_s17  }
  0xa8   : > { %s801_s9 = sshll.u32 %s1247_s29, 6  ;;  %s827_s15 = sshll.u32 %s1081_s21, 10 }
  0xa9   : > { %s292_s30 = scalar_lea.vmem [#allocation5], %s801_s9  ;;  %s1374_s16 = scalar_lea.hbm %s1428_s3, %s827_s15 }
  0xaa   : > { %s588_s24 = sshll.u32 %s292_s30, 4  ;;  %s563_s21 = scalar_lea.sflag [#allocation4], %s1247_s29  ;;  %s1369_s24 = int_to_ptr.vmem [resolvable:$true] %s588_s24 }
  0xab   : > { %s1003_s13 = scalar_lea.vmem %s1369_s24, 1024  ;;  %s1097_s11 = smov [#allocation5]  }
  0xac   : > { %p1004_p4 = scmp.ne.s32.totalorder %s1369_s24, %s1003_s13  ;;  %s1007_s14 = sshll.u32 %s1097_s11, 4  ;;  %s1008_s14 = int_to_ptr.vmem [resolvable:$false] %s1007_s14 }
  0xad   : > { %s1009_s28 = scalar_lea.vmem %s1008_s14, 2048  ;;  %p1010_p1 = scmp.lt.s32.totalorder %s1369_s24, %s1008_s14 }
  0xae   : > { %p1005_p10 = pnand %p1004_p4, %p1439_p11  ;;  %p1011_p2 = scmp.lt.s32.totalorder %s1009_s28, %s1003_s13 }
  0xb0   : > { %p1006_p12 = pneg %p1005_p10  ;;  %p1012_p5 = por %p1011_p2, %p1010_p1 }
  0xb2   : > { %p1013_p9 = pnand %p1012_p5, %p1006_p12 }
 0x134   : > { %v454_v12 = vpop.f32.mrb[0].mxu0  ;;  %v466_v17 = vpop.f32.mrb[0].mxu1 }
 0x135   : > { %477 = vst [vmem:[%s292_s30] sm:$0xff] %v454_v12  ;;  %481 = vst [vmem:[%s292_s30 + $0x20] sm:$0xff] %v466_v17  ;;  %v456_v39 = vpop.f32.mrb[1].mxu0  ;;  %v468_v40 = vpop.f32.mrb[1].mxu1 }
 0x136   : > { %478 = vst [vmem:[%s292_s30 + $0x8] sm:$0xff] %v456_v39  ;;  %482 = vst [vmem:[%s292_s30 + $0x28] sm:$0xff] %v468_v40 }
 0x138   : > { %v460_v41 = vpop.f32.mrb[2].mxu0  ;;  %v472_v42 = vpop.f32.mrb[2].mxu1 }
 0x139   : > { %479 = vst [vmem:[%s292_s30 + $0x10] sm:$0xff] %v460_v41  ;;  %483 = vst [vmem:[%s292_s30 + $0x30] sm:$0xff] %v472_v42  ;;  %v462_v43 = vpop.f32.mrb[3].mxu0  ;;  %v474_v44 = vpop.f32.mrb[3].mxu1 }
 0x13a   : > { %480 = vst [vmem:[%s292_s30 + $0x18] sm:$0xff] %v462_v43  ;;  %484 = vst [vmem:[%s292_s30 + $0x38] sm:$0xff] %v474_v44 }
 0x13b   : > { %1016 = shalt.err (!%p1013_p9)
}
 0x13c   : > { %s1017_s12 = scalar_lea.hbm %s1374_s16, 1024  ;;  %s1021_s30 = scalar_lea.hbm %s1428_s3, 2048 }
 0x13d   : > { %p1018_p8 = scmp.ne.s32.totalorder %s1374_s16, %s1017_s12  ;;  %p1022_p13 = scmp.lt.u32.totalorder %s1374_s16, %s1428_s3 }
 0x13e   : > { %p1023_p3 = scmp.lt.u32.totalorder %s1021_s30, %s1017_s12  ;;  %p1025_p4 = scmp.lt.u32.totalorder %s1017_s12, %s1374_s16 }
 0x13f   : > { %p1019_p0 = pnand %p1018_p8, %p1439_p11 }
 0x140   : > { %p1024_p6 = por %p1023_p3, %p1022_p13 }
 0x141   : > { %p1020_p7 = pneg %p1019_p0 }
 0x142   : > { %p1026_p10 = por %p1025_p4, %p1024_p6 }
 0x144   : > { %p1027_p12 = pnand %p1026_p10, %p1020_p7 }
 0x146   : > { %1030 = shalt.err (!%p1027_p12)
}
 0x147   : > { %s1098_s17 = smov 256   ;;  %s1099_s13 = smov 16  }
 0x148   : > { %834 = dma.vmem_to_hbm [thread:$0]  (%p1439_p11), %s1369_s24, 1024, %s1374_s16, %s563_s21, %s1098_s17, %s1098_s17, %s1099_s13  }
 0x149 PF: > { %s635_s11 = sand.u32 1, %s1069_s18   ;;  %p1440_p1 = scmp.ne.s32.totalorder %s1435_s8, 0 }
 0x14a   : > { %p1441_p2 = scmp.ge.s32.totalorder %s1089_s23, 2  ;;  %s636_s14 = scalar_lea.sflag [#allocation4], %s635_s11 }
 0x14c   : > { %p845_p5 = pnand %p1441_p2, %p1440_p1 }
 0x14e   : > { %1060 = dma.done.wait (!%p845_p5), %s636_s14, 1024  }
 0x14f   : > { %1062 = vsyncadd (!%p845_p5), %s636_s14, 4294966272  ;;  %s644_s28 = sand.u32 1, %s793_s25  }
 0x150   : > { %s645_s12 = scalar_lea.sflag [#allocation7], %s644_s28 }
 0x151   : > { %1064 = dma.done.wait (!%p845_p5), %s645_s12, 288  }
 0x152   : > { %1066 = vsyncadd (!%p845_p5), %s645_s12, 4294967008  ;;  %s25_s23 = sadd.s32 1, %s1089_s23   ;;  %s1442_s18 = smov %s1073_s19 }
 0x153   : > { %p22_p11 = scmp.ge.s32.totalorder %s25_s23, 4   ;;  %s1443_s19 = smov %s1077_s20 }
 0x154   : > { %s1444_s20 = smov %s1192_s7  ;;  %s1445_s21 = smov %s1085_s22 }
 0x155   : > { %s1446_s22 = smov %s1448_s26  ;;  %24 = sbr.rel (!%p22_p11) target bundleno = 8 (0x8), region = 112 }
 0x15c   :  { %659 = vsyncpa [#allocation3], 1 }
 0x15d   :  { %661 = vsyncpa [#allocation3 + $0x1], 1 }
 0x15e   :  { %662 = vsyncpa [#allocation4], 1 }
 0x15f   :  { %664 = vsyncpa [#allocation4 + $0x1], 1 }
 0x160   :  { %665 = vsyncpa [#allocation7], 1 }
 0x161   :  { %667 = vsyncpa [#allocation7 + $0x1], 1 }

</bundles_post_ra>
